<compile_context>
chip_gen: v5e
topology: v5e:2x2
jax: 0.10.0
libtpu: 0.0.40
codegen_flags: <defaults>
</compile_context>

<pallas_src>
import jax
import jax.numpy as jnp
from jax.experimental import pallas as pl
from jax.experimental.pallas import tpu as pltpu

# ----- small-but-aligned model sizes (module uses embedding/hidden = 256, layers = 1) -----
BATCH = 8            # multiple of 8 -> full sublane occupancy
VOCAB = 48           # "input_size" = hindi vocab size (small example value)
VOCAB_PAD = 128      # lane-dense padded vocab for the fc output / embedding rows
EMBED = 128          # embedding_size (small, vreg-aligned)
HIDDEN = 128         # hidden_size (small, vreg-aligned: gate slices fall on vreg boundaries)
LAYERS = 1           # module-level `layers = 1`


def _round_up(x, m):
    return (x + m - 1) // m * m


# ---------------------------------------------------------------------------
# Fused decoder-step kernel: embed (one-hot matmul) + LSTM cell + fc, all in VMEM
# ---------------------------------------------------------------------------
def decoder_step_kernel(tok_ref, h_ref, c_ref,
                        embed_ref, wih_ref, whh_ref, b_ref, fcw_ref, fcb_ref,
                        logits_ref, h_out_ref, c_out_ref):
    B = tok_ref.shape[0]
    Vp = embed_ref.shape[0]
    H = h_ref.shape[-1]

    # --- embedding gather as one-hot @ table (MXU) ---
    tok = tok_ref[...]                                                # (B, 1) int32
    onehot = (tok == jax.lax.broadcasted_iota(jnp.int32, (B, Vp), 1)) # (B, Vp) bool
    emb = jnp.dot(onehot.astype(jnp.float32), embed_ref[...],
                  preferred_element_type=jnp.float32)                 # (B, E)

    # --- LSTM cell (torch gate order i, f, g, o; weights pre-transposed to (In, 4H)) ---
    h = h_ref[...]
    c = c_ref[...]
    gates = (jnp.dot(emb, wih_ref[...], preferred_element_type=jnp.float32)
             + jnp.dot(h, whh_ref[...], preferred_element_type=jnp.float32)
             + b_ref[...])                                            # (B, 4H)
    i_g = jax.nn.sigmoid(gates[:, 0 * H:1 * H])
    f_g = jax.nn.sigmoid(gates[:, 1 * H:2 * H])
    g_g = jnp.tanh(gates[:, 2 * H:3 * H])
    o_g = jax.nn.sigmoid(gates[:, 3 * H:4 * H])
    c_new = f_g * c + i_g * g_g
    h_new = o_g * jnp.tanh(c_new)

    # --- output projection (lane-dense padded vocab) ---
    logits_ref[...] = (jnp.dot(h_new, fcw_ref[...],
                               preferred_element_type=jnp.float32) + fcb_ref[...])
    h_out_ref[...] = h_new
    c_out_ref[...] = c_new


# ---------------------------------------------------------------------------
# jitted wrapper: pad batch to sublane multiple, single pallas_call, slice back
# ---------------------------------------------------------------------------
@jax.jit
def decoder_forward(params, x, hidden_state, cell_state):
    """Mirrors decoder.forward: x (B,), state (layers, B, H) -> (logits, h, c)."""
    B = x.shape[0]
    Bp = _round_up(max(B, 8), 8)

    # TODO(synk): module fixes layers=1; a num_layers>1 stack would loop layers in-kernel.
    h = hidden_state[0]
    c = cell_state[0]

    tok = x.reshape(-1, 1).astype(jnp.int32)                      # x.reshape(-1, 1)
    tok_p = jnp.zeros((Bp, 1), jnp.int32).at[:B].set(tok)
    h_p = jnp.zeros((Bp, HIDDEN), jnp.float32).at[:B].set(h)
    c_p = jnp.zeros((Bp, HIDDEN), jnp.float32).at[:B].set(c)

    vmem = pl.BlockSpec(memory_space=pltpu.MemorySpace.VMEM)
    logits_p, h_new_p, c_new_p = pl.pallas_call(
        decoder_step_kernel,
        out_shape=(jax.ShapeDtypeStruct((Bp, VOCAB_PAD), jnp.float32),
                   jax.ShapeDtypeStruct((Bp, HIDDEN), jnp.float32),
                   jax.ShapeDtypeStruct((Bp, HIDDEN), jnp.float32)),
        in_specs=[vmem] * 9,
        out_specs=(vmem, vmem, vmem),
    )(tok_p, h_p, c_p,
      params["embed_pad"], params["wih_t"], params["whh_t"], params["b_gates"],
      params["fc_wT_pad"], params["fc_b_pad"])

    logits = logits_p[:B, :VOCAB]
    h_new = h_new_p[:B][None]        # back to (layers=1, B, H)
    c_new = c_new_p[:B][None]
    return logits, h_new, c_new


# ---------------------------------------------------------------------------
# deterministic parameter init (weights pre-transposed, vocab padded to 128 lanes)
# ---------------------------------------------------------------------------
def init_params(key):
    def nrm(k, shape, scale=0.1):
        return scale * jax.random.normal(k, shape, jnp.float32)

    ks = jax.random.split(key, 6)
    p = {}
    embed = nrm(ks[0], (VOCAB, EMBED))
    p["embed_pad"] = jnp.zeros((VOCAB_PAD, EMBED), jnp.float32).at[:VOCAB].set(embed)
    p["wih_t"] = nrm(ks[1], (EMBED, 4 * HIDDEN))          # W_ih^T, gate order i,f,g,o
    p["whh_t"] = nrm(ks[2], (HIDDEN, 4 * HIDDEN))         # W_hh^T
    p["b_gates"] = nrm(ks[3], (1, 4 * HIDDEN))            # b_ih + b_hh combined
    fc_w = nrm(ks[4], (HIDDEN, VOCAB))                    # fc weight, pre-transposed
    fc_b = nrm(ks[5], (1, VOCAB))
    p["fc_wT_pad"] = jnp.zeros((HIDDEN, VOCAB_PAD), jnp.float32).at[:, :VOCAB].set(fc_w)
    p["fc_b_pad"] = jnp.zeros((1, VOCAB_PAD), jnp.float32).at[:, :VOCAB].set(fc_b)
    return p


# ---------------------------------------------------------------------------
# pure-JAX reference (same math, high-precision matmuls) for a sanity check
# ---------------------------------------------------------------------------
def decoder_reference(params, x, hidden_state, cell_state):
    H = HIDDEN
    hp = jax.lax.Precision.HIGHEST
    emb = params["embed_pad"][:VOCAB][x]                  # (B, E) gather
    h = hidden_state[0]
    c = cell_state[0]
    gates = (jnp.dot(emb, params["wih_t"], precision=hp)
             + jnp.dot(h, params["whh_t"], precision=hp)
             + params["b_gates"])
    i_g = jax.nn.sigmoid(gates[:, 0 * H:1 * H])
    f_g = jax.nn.sigmoid(gates[:, 1 * H:2 * H])
    g_g = jnp.tanh(gates[:, 2 * H:3 * H])
    o_g = jax.nn.sigmoid(gates[:, 3 * H:4 * H])
    c_new = f_g * c + i_g * g_g
    h_new = o_g * jnp.tanh(c_new)
    logits = (jnp.dot(h_new, params["fc_wT_pad"][:, :VOCAB], precision=hp)
              + params["fc_b_pad"][:, :VOCAB])
    return logits, h_new[None], c_new[None]


if __name__ == "__main__":
    key = jax.random.PRNGKey(0)
    pk, xk, hk, ck = jax.random.split(key, 4)
    params = init_params(pk)

    x = jax.random.randint(xk, (BATCH,), 0, VOCAB, dtype=jnp.int32)
    h0 = 0.1 * jax.random.normal(hk, (LAYERS, BATCH, HIDDEN), jnp.float32)
    c0 = 0.1 * jax.random.normal(ck, (LAYERS, BATCH, HIDDEN), jnp.float32)

    logits, h1, c1 = decoder_forward(params, x, h0, c0)
    logits = jax.block_until_ready(logits)

    assert logits.shape == (BATCH, VOCAB), logits.shape
    assert h1.shape == (LAYERS, BATCH, HIDDEN), h1.shape
    assert c1.shape == (LAYERS, BATCH, HIDDEN), c1.shape
    assert bool(jnp.all(jnp.isfinite(logits)))

    ref_logits, ref_h, ref_c = decoder_reference(params, x, h0, c0)
    assert bool(jnp.allclose(logits, ref_logits, rtol=2e-2, atol=2e-2))
    assert bool(jnp.allclose(h1, ref_h, rtol=2e-2, atol=2e-2))
    assert bool(jnp.allclose(c1, ref_c, rtol=2e-2, atol=2e-2))

    print("KERNEL_OK")
</pallas_src>

<mosaic_0001>
module attributes {stable_mosaic.version = 11 : i64} {
  func.func @decoder_step_kernel(%arg0: memref<8x1xi32, #tpu.memory_space<vmem>>, %arg1: memref<8x128xf32, #tpu.memory_space<vmem>>, %arg2: memref<8x128xf32, #tpu.memory_space<vmem>>, %arg3: memref<128x128xf32, #tpu.memory_space<vmem>>, %arg4: memref<128x512xf32, #tpu.memory_space<vmem>>, %arg5: memref<128x512xf32, #tpu.memory_space<vmem>>, %arg6: memref<1x512xf32, #tpu.memory_space<vmem>>, %arg7: memref<128x128xf32, #tpu.memory_space<vmem>>, %arg8: memref<1x128xf32, #tpu.memory_space<vmem>>, %arg9: memref<8x128xf32, #tpu.memory_space<vmem>>, %arg10: memref<8x128xf32, #tpu.memory_space<vmem>>, %arg11: memref<8x128xf32, #tpu.memory_space<vmem>>) attributes {dimension_semantics = [], scalar_prefetch = 0 : i64, scratch_operands = 0 : i64, tpu.core_type = #tpu.core_type<tc>} {
    %c0 = arith.constant 0 : index
    %c0_0 = arith.constant 0 : index
    %0 = vector.load %arg0[%c0, %c0_0] : memref<8x1xi32, #tpu.memory_space<vmem>>, vector<8x1xi32>
    %1 = tpu.iota {dimensions = array<i32: 1>} : vector<8x128xi32>
    %2 = vector.broadcast %0 : vector<8x1xi32> to vector<8x128xi32>
    %3 = arith.cmpi eq, %2, %1 : vector<8x128xi32>
    %4 = arith.extui %3 : vector<8x128xi1> to vector<8x128xi32>
    %5 = arith.sitofp %4 : vector<8x128xi32> to vector<8x128xf32>
    %c0_1 = arith.constant 0 : index
    %c0_2 = arith.constant 0 : index
    %6 = vector.load %arg3[%c0_1, %c0_2] : memref<128x128xf32, #tpu.memory_space<vmem>>, vector<128x128xf32>
    %cst = arith.constant dense<0.000000e+00> : vector<8x128xf32>
    %7 = tpu.matmul %5, %6, %cst {dimension_numbers = #tpu.dot_dimension_numbers<[1], [0], [0], [1], [0, 0, 1, 1], [], []>} : vector<8x128xf32>, vector<128x128xf32>, vector<8x128xf32> -> vector<8x128xf32>
    %c0_3 = arith.constant 0 : index
    %c0_4 = arith.constant 0 : index
    %8 = vector.load %arg1[%c0_3, %c0_4] : memref<8x128xf32, #tpu.memory_space<vmem>>, vector<8x128xf32>
    %c0_5 = arith.constant 0 : index
    %c0_6 = arith.constant 0 : index
    %9 = vector.load %arg2[%c0_5, %c0_6] : memref<8x128xf32, #tpu.memory_space<vmem>>, vector<8x128xf32>
    %c0_7 = arith.constant 0 : index
    %c0_8 = arith.constant 0 : index
    %10 = vector.load %arg4[%c0_7, %c0_8] : memref<128x512xf32, #tpu.memory_space<vmem>>, vector<128x512xf32>
    %cst_9 = arith.constant dense<0.000000e+00> : vector<8x512xf32>
    %11 = tpu.matmul %7, %10, %cst_9 {dimension_numbers = #tpu.dot_dimension_numbers<[1], [0], [0], [1], [0, 0, 1, 1], [], []>} : vector<8x128xf32>, vector<128x512xf32>, vector<8x512xf32> -> vector<8x512xf32>
    %c0_10 = arith.constant 0 : index
    %c0_11 = arith.constant 0 : index
    %12 = vector.load %arg5[%c0_10, %c0_11] : memref<128x512xf32, #tpu.memory_space<vmem>>, vector<128x512xf32>
    %cst_12 = arith.constant dense<0.000000e+00> : vector<8x512xf32>
    %13 = tpu.matmul %8, %12, %cst_12 {dimension_numbers = #tpu.dot_dimension_numbers<[1], [0], [0], [1], [0, 0, 1, 1], [], []>} : vector<8x128xf32>, vector<128x512xf32>, vector<8x512xf32> -> vector<8x512xf32>
    %14 = arith.addf %11, %13 : vector<8x512xf32>
    %c0_13 = arith.constant 0 : index
    %c0_14 = arith.constant 0 : index
    %15 = vector.load %arg6[%c0_13, %c0_14] : memref<1x512xf32, #tpu.memory_space<vmem>>, vector<1x512xf32>
    %16 = vector.broadcast %15 : vector<1x512xf32> to vector<8x512xf32>
    %17 = arith.addf %14, %16 : vector<8x512xf32>
    %18 = vector.extract_strided_slice %17 {offsets = [0, 0], sizes = [8, 128], strides = [1, 1]} : vector<8x512xf32> to vector<8x128xf32>
    %19 = arith.negf %18 : vector<8x128xf32>
    %20 = math.exp %19 : vector<8x128xf32>
    %cst_15 = arith.constant 1.000000e+00 : f32
    %21 = vector.broadcast %cst_15 : f32 to vector<8x128xf32>
    %22 = arith.addf %21, %20 : vector<8x128xf32>
    %23 = arith.divf %21, %22 : vector<8x128xf32>
    %24 = vector.extract_strided_slice %17 {offsets = [0, 128], sizes = [8, 128], strides = [1, 1]} : vector<8x512xf32> to vector<8x128xf32>
    %25 = arith.negf %24 : vector<8x128xf32>
    %26 = math.exp %25 : vector<8x128xf32>
    %cst_16 = arith.constant 1.000000e+00 : f32
    %27 = vector.broadcast %cst_16 : f32 to vector<8x128xf32>
    %28 = arith.addf %27, %26 : vector<8x128xf32>
    %29 = arith.divf %27, %28 : vector<8x128xf32>
    %30 = vector.extract_strided_slice %17 {offsets = [0, 256], sizes = [8, 128], strides = [1, 1]} : vector<8x512xf32> to vector<8x128xf32>
    %31 = math.tanh %30 : vector<8x128xf32>
    %32 = vector.extract_strided_slice %17 {offsets = [0, 384], sizes = [8, 128], strides = [1, 1]} : vector<8x512xf32> to vector<8x128xf32>
    %33 = arith.negf %32 : vector<8x128xf32>
    %34 = math.exp %33 : vector<8x128xf32>
    %cst_17 = arith.constant 1.000000e+00 : f32
    %35 = vector.broadcast %cst_17 : f32 to vector<8x128xf32>
    %36 = arith.addf %35, %34 : vector<8x128xf32>
    %37 = arith.divf %35, %36 : vector<8x128xf32>
    %38 = arith.mulf %29, %9 : vector<8x128xf32>
    %39 = arith.mulf %23, %31 : vector<8x128xf32>
    %40 = arith.addf %38, %39 : vector<8x128xf32>
    %41 = math.tanh %40 : vector<8x128xf32>
    %42 = arith.mulf %37, %41 : vector<8x128xf32>
    %c0_18 = arith.constant 0 : index
    %c0_19 = arith.constant 0 : index
    %43 = vector.load %arg7[%c0_18, %c0_19] : memref<128x128xf32, #tpu.memory_space<vmem>>, vector<128x128xf32>
    %cst_20 = arith.constant dense<0.000000e+00> : vector<8x128xf32>
    %44 = tpu.matmul %42, %43, %cst_20 {dimension_numbers = #tpu.dot_dimension_numbers<[1], [0], [0], [1], [0, 0, 1, 1], [], []>} : vector<8x128xf32>, vector<128x128xf32>, vector<8x128xf32> -> vector<8x128xf32>
    %c0_21 = arith.constant 0 : index
    %c0_22 = arith.constant 0 : index
    %45 = vector.load %arg8[%c0_21, %c0_22] : memref<1x128xf32, #tpu.memory_space<vmem>>, vector<1x128xf32>
    %46 = vector.broadcast %45 : vector<1x128xf32> to vector<8x128xf32>
    %47 = arith.addf %44, %46 : vector<8x128xf32>
    %c0_23 = arith.constant 0 : index
    %c0_24 = arith.constant 0 : index
    %48 = vector.load %arg9[%c0_23, %c0_24] : memref<8x128xf32, #tpu.memory_space<vmem>>, vector<8x128xf32>
    tpu.vector_store %arg9[%c0_23, %c0_24], %47 {strides = array<i32>} : memref<8x128xf32, #tpu.memory_space<vmem>>, vector<8x128xf32>,
    %c0_25 = arith.constant 0 : index
    %c0_26 = arith.constant 0 : index
    %49 = vector.load %arg10[%c0_25, %c0_26] : memref<8x128xf32, #tpu.memory_space<vmem>>, vector<8x128xf32>
    tpu.vector_store %arg10[%c0_25, %c0_26], %42 {strides = array<i32>} : memref<8x128xf32, #tpu.memory_space<vmem>>, vector<8x128xf32>,
    %c0_27 = arith.constant 0 : index
    %c0_28 = arith.constant 0 : index
    %50 = vector.load %arg11[%c0_27, %c0_28] : memref<8x128xf32, #tpu.memory_space<vmem>>, vector<8x128xf32>
    tpu.vector_store %arg11[%c0_27, %c0_28], %40 {strides = array<i32>} : memref<8x128xf32, #tpu.memory_space<vmem>>, vector<8x128xf32>,
    return
  }
}

</mosaic_0001>

<bundles_post_ra>
// kernel: decoder_forward.1
= control target key start
LH: loop header
LB: loop body
LE: loop exit
PB: predicated region body
PF: predicated region fallthrough
CT: control target
= control target key end

     0   :  { %17 = vsyncpa [#allocation3], 0  ;;  %s973_s0 = inlined_call_operand.vmem [shape: s32[8,1], index: 0, kind: input, shape index: {}]   ;;  %s974_s1 = inlined_call_operand.vmem [shape: f32[8,128], index: 1, kind: input, shape index: {}]   ;;  %s975_s2 = inlined_call_operand.vmem [shape: f32[8,128], index: 2, kind: input, shape index: {}]   ;;  %s976_s3 = inlined_call_operand.hbm [shape: f32[128,128], index: 3, kind: input, shape index: {}]   ;;  %s977_s4 = inlined_call_operand.hbm [shape: f32[128,512], index: 4, kind: input, shape index: {}]   ;;  %s978_s5 = inlined_call_operand.hbm [shape: f32[128,512], index: 5, kind: input, shape index: {}]   ;;  %s979_s6 = inlined_call_operand.hbm [shape: f32[1,512], index: 6, kind: input, shape index: {}]   ;;  %s980_s7 = inlined_call_operand.hbm [shape: f32[128,128], index: 7, kind: input, shape index: {}]   ;;  %s981_s8 = inlined_call_operand.vmem [shape: f32[1,128], index: 8, kind: input, shape index: {}]   ;;  %s982_s9 = inlined_call_operand.hbm [shape: f32[8,128], index: 9, kind: output, shape index: {0}]   ;;  %s983_s10 = inlined_call_operand.hbm [shape: f32[8,128], index: 10, kind: output, shape index: {1}]   ;;  %s984_s11 = inlined_call_operand.hbm [shape: f32[8,128], index: 11, kind: output, shape index: {2}]  }
   0x1   :  { %18 = vsyncpa [#allocation6], 0 }
   0x2   :  { %19 = vsyncpa [#allocation9], 0 }
   0x3   :  { %20 = vsyncpa [#allocation4], 0  ;;  %s45_s19 = sshll.u32 %s977_s4, 4  ;;  %s46_s19 = int_to_ptr.hbm [resolvable:$true] %s45_s19 }
   0x4   :  { %21 = vsyncpa [#allocation13], 0  ;;  %s857_s20 = smov [#allocation5]   ;;  %s72_s24 = sshll.u32 %s979_s6, 4  ;;  %s73_s24 = int_to_ptr.hbm [resolvable:$true] %s72_s24 }
   0x5   :  { %s47_s21 = sshll.u32 %s857_s20, 4  ;;  %s858_s25 = smov 512   ;;  %s48_s21 = int_to_ptr.vmem [resolvable:$true] %s47_s21 }
   0x6   :  { %s859_s26 = smov 32   ;;  %s860_s27 = smov [#allocation8]  }
   0x7   :  { %53 = dma.hbm_to_vmem [thread:$0]  %s46_s19, 8192, %s48_s21, [#allocation6], %s858_s25, %s858_s25, %s859_s26  }
   0x8   :  { %s74_s28 = sshll.u32 %s860_s27, 4  ;;  %s32_s12 = sshll.u32 %s976_s3, 4  ;;  %s75_s28 = int_to_ptr.vmem [resolvable:$true] %s74_s28  ;;  %s33_s12 = int_to_ptr.hbm [resolvable:$true] %s32_s12 }
   0x9   :  { %77 = dma.hbm_to_vmem [thread:$0]  %s73_s24, 64, %s75_s28, [#allocation9]  }
   0xa   :  { %s861_s4 = smov [#allocation2]   ;;  %s58_s6 = sshll.u32 %s978_s5, 4  ;;  %s59_s6 = int_to_ptr.hbm [resolvable:$true] %s58_s6 }
   0xb   :  { %s34_s13 = sshll.u32 %s861_s4, 4  ;;  %s862_s16 = smov 128   ;;  %s35_s13 = int_to_ptr.vmem [resolvable:$true] %s34_s13 }
   0xc   :  { %s863_s17 = smov 8   ;;  %s864_s18 = smov [#allocation7]  }
   0xd   :  { %40 = dma.hbm_to_vmem [thread:$0]  %s33_s12, 2048, %s35_s13, [#allocation3], %s862_s16, %s862_s16, %s863_s17  }
   0xe   :  { %s60_s19 = sshll.u32 %s864_s18, 4  ;;  %s82_s3 = sshll.u32 %s980_s7, 4  ;;  %s61_s19 = int_to_ptr.vmem [resolvable:$true] %s60_s19  ;;  %s83_s3 = int_to_ptr.hbm [resolvable:$true] %s82_s3 }
   0xf   :  { %66 = dma.hbm_to_vmem [thread:$0]  %s59_s6, 8192, %s61_s19, [#allocation6], %s858_s25, %s858_s25, %s859_s26  }
  0x10   :  { %s865_s22 = smov [#allocation10]  }
  0x11   :  { %s84_s23 = sshll.u32 %s865_s22, 4  ;;  %s85_s23 = int_to_ptr.vmem [resolvable:$true] %s84_s23 }
  0x12   :  { %90 = dma.hbm_to_vmem [thread:$0]  %s83_s3, 2048, %s85_s23, [#allocation9], %s862_s16, %s862_s16, %s863_s17  }
  0x13   :  { %847 = dma.done.wait [#allocation3], 2048  }
  0x14   :  { %848 = vsyncadd [#allocation3], 4294965248 }
  0x15   :  { %849 = dma.done.wait [#allocation6], 16384  }
  0x16   :  { %850 = vsyncadd [#allocation6], 4294950912 }
  0x17   :  { %851 = dma.done.wait [#allocation9], 2112  }
  0x18   :  { %852 = vsyncadd [#allocation9], 4294965184  ;;  %v866_v0 = vmov 0   ;;  %v113_v1 = vld [vmem:[%s973_s0] sm:$0xff]  ;;  %v137_v2 = vld [vmem:[#allocation2 + $0x78] sm:$0xff]  ;;  %s586_s29 = sshll.u32 %s983_s10, 4  ;;  %s587_s29 = int_to_ptr.hbm [resolvable:$true] %s586_s29 }
  0x19   :  { %637 = vset.pattern.permute.xlu0 %v866_v0  ;;  %v136_v3 = vld [vmem:[#allocation2 + $0x70] sm:$0xff]  ;;  %138 = vmatpush.msra.mxu0 %v137_v2  ;;  %v135_v4 = vld [vmem:[#allocation2 + $0x68] sm:$0xff]  ;;  %v134_v5 = vld [vmem:[#allocation2 + $0x60] sm:$0xff]  ;;  %s869_s30 = smov [#allocation14]   ;;  %s597_s14 = sshll.u32 %s984_s11, 4  ;;  %s598_s14 = int_to_ptr.hbm [resolvable:$true] %s597_s14 }
  0x1a   :  { %117 = vperm.xlu0 %637, %v113_v1   ;;  %v133_v6 = vld [vmem:[#allocation2 + $0x58] sm:$0xff]  ;;  %v132_v7 = vld [vmem:[#allocation2 + $0x50] sm:$0xff]  ;;  %v131_v8 = vld [vmem:[#allocation2 + $0x48] sm:$0xff]  ;;  %s595_s12 = sshll.u32 %s869_s30, 4  ;;  %s870_s16 = smov [#allocation11]   ;;  %s596_s12 = int_to_ptr.vmem [resolvable:$true] %s595_s12 }
  0x1b   :  { %139 = vmatpush.msra.mxu0 %v136_v3  ;;  %v130_v9 = vld [vmem:[#allocation2 + $0x40] sm:$0xff]  ;;  %v129_v10 = vld [vmem:[#allocation2 + $0x38] sm:$0xff]  ;;  %v128_v11 = vld [vmem:[#allocation2 + $0x30] sm:$0xff]  ;;  %s573_s10 = sshll.u32 %s870_s16, 4  ;;  %s575_s19 = sshll.u32 %s982_s9, 4  ;;  %s574_s10 = int_to_ptr.vmem [resolvable:$true] %s573_s10  ;;  %s576_s19 = int_to_ptr.hbm [resolvable:$true] %s575_s19 }
  0x1c   :  { %v127_v12 = vld [vmem:[#allocation2 + $0x28] sm:$0xff]  ;;  %v126_v13 = vld [vmem:[#allocation2 + $0x20] sm:$0xff]  ;;  %v125_v14 = vld [vmem:[#allocation2 + $0x18] sm:$0xff] }
  0x1d   :  { %140 = vmatpush.msra.mxu0 %v135_v4  ;;  %v124_v15 = vld [vmem:[#allocation2 + $0x10] sm:$0xff]  ;;  %v123_v16 = vld [vmem:[#allocation2 + $0x8] sm:$0xff]  ;;  %v122_v17 = vld [vmem:[#allocation2] sm:$0xff]  ;;  %v114_v4 = vlaneseq }
  0x1e   :  { %v284_v18 = vld [vmem:[#allocation7 + $0x1e0] sm:$0xff]  ;;  %v285_v19 = vld [vmem:[#allocation7 + $0x1e8] sm:$0xff]  ;;  %v286_v20 = vld [vmem:[#allocation7 + $0x1f0] sm:$0xff] }
  0x1f   :  { %141 = vmatpush.msra.mxu0 %v134_v5  ;;  %288 = vmatpush.msra.mxu1 %v284_v18  ;;  %v287_v21 = vld [vmem:[#allocation7 + $0x1f8] sm:$0xff]  ;;  %v280_v22 = vld [vmem:[#allocation7 + $0x1c0] sm:$0xff]  ;;  %v281_v23 = vld [vmem:[#allocation7 + $0x1c8] sm:$0xff] }
  0x20   :  { %308 = vmatpush.msra.mxu2 %v285_v19  ;;  %328 = vmatpush.msra.mxu3 %v286_v20  ;;  %v282_v24 = vld [vmem:[#allocation7 + $0x1d0] sm:$0xff]  ;;  %v283_v25 = vld [vmem:[#allocation7 + $0x1d8] sm:$0xff]  ;;  %v276_v26 = vld [vmem:[#allocation7 + $0x1a0] sm:$0xff] }
  0x21   :  { %142 = vmatpush.msra.mxu0 %v133_v6  ;;  %289 = vmatpush.msra.mxu1 %v280_v22  ;;  %v277_v27 = vld [vmem:[#allocation7 + $0x1a8] sm:$0xff]  ;;  %v278_v28 = vld [vmem:[#allocation7 + $0x1b0] sm:$0xff]  ;;  %v279_v29 = vld [vmem:[#allocation7 + $0x1b8] sm:$0xff] }
  0x22   :  { %309 = vmatpush.msra.mxu2 %v281_v23  ;;  %329 = vmatpush.msra.mxu3 %v282_v24  ;;  %v272_v30 = vld [vmem:[#allocation7 + $0x180] sm:$0xff]  ;;  %v273_v31 = vld [vmem:[#allocation7 + $0x188] sm:$0xff]  ;;  %v274_v32 = vld [vmem:[#allocation7 + $0x190] sm:$0xff]  ;;  %v867_v24 = vmov 1.0  }
  0x23   :  { %143 = vmatpush.msra.mxu0 %v132_v7  ;;  %290 = vmatpush.msra.mxu1 %v276_v26  ;;  %v275_v33 = vld [vmem:[#allocation7 + $0x198] sm:$0xff]  ;;  %v268_v34 = vld [vmem:[#allocation7 + $0x160] sm:$0xff]  ;;  %v269_v35 = vld [vmem:[#allocation7 + $0x168] sm:$0xff] }
  0x24   :  { %310 = vmatpush.msra.mxu2 %v277_v27  ;;  %330 = vmatpush.msra.mxu3 %v278_v28  ;;  %v270_v36 = vld [vmem:[#allocation7 + $0x170] sm:$0xff]  ;;  %v271_v37 = vld [vmem:[#allocation7 + $0x178] sm:$0xff]  ;;  %v264_v38 = vld [vmem:[#allocation7 + $0x140] sm:$0xff] }
  0x25   :  { %144 = vmatpush.msra.mxu0 %v131_v8  ;;  %291 = vmatpush.msra.mxu1 %v272_v30  ;;  %v265_v39 = vld [vmem:[#allocation7 + $0x148] sm:$0xff]  ;;  %v266_v40 = vld [vmem:[#allocation7 + $0x150] sm:$0xff]  ;;  %v267_v41 = vld [vmem:[#allocation7 + $0x158] sm:$0xff] }
  0x26   :  { %311 = vmatpush.msra.mxu2 %v273_v31  ;;  %331 = vmatpush.msra.mxu3 %v274_v32  ;;  %v260_v42 = vld [vmem:[#allocation7 + $0x120] sm:$0xff]  ;;  %v261_v43 = vld [vmem:[#allocation7 + $0x128] sm:$0xff]  ;;  %v262_v44 = vld [vmem:[#allocation7 + $0x130] sm:$0xff] }
  0x27   :  { %145 = vmatpush.msra.mxu0 %v130_v9  ;;  %292 = vmatpush.msra.mxu1 %v268_v34  ;;  %v263_v45 = vld [vmem:[#allocation7 + $0x138] sm:$0xff]  ;;  %v256_v46 = vld [vmem:[#allocation7 + $0x100] sm:$0xff]  ;;  %v257_v47 = vld [vmem:[#allocation7 + $0x108] sm:$0xff] }
  0x28   :  { %312 = vmatpush.msra.mxu2 %v269_v35  ;;  %332 = vmatpush.msra.mxu3 %v270_v36  ;;  %v258_v48 = vld [vmem:[#allocation7 + $0x110] sm:$0xff]  ;;  %v259_v49 = vld [vmem:[#allocation7 + $0x118] sm:$0xff]  ;;  %v252_v50 = vld [vmem:[#allocation7 + $0xe0] sm:$0xff] }
  0x29   :  { %146 = vmatpush.msra.mxu0 %v129_v10  ;;  %293 = vmatpush.msra.mxu1 %v264_v38  ;;  %v253_v51 = vld [vmem:[#allocation7 + $0xe8] sm:$0xff]  ;;  %v254_v52 = vld [vmem:[#allocation7 + $0xf0] sm:$0xff]  ;;  %v255_v53 = vld [vmem:[#allocation7 + $0xf8] sm:$0xff] }
  0x2a   :  { %313 = vmatpush.msra.mxu2 %v265_v39  ;;  %333 = vmatpush.msra.mxu3 %v266_v40  ;;  %v248_v54 = vld [vmem:[#allocation7 + $0xc0] sm:$0xff]  ;;  %v249_v55 = vld [vmem:[#allocation7 + $0xc8] sm:$0xff]  ;;  %v250_v56 = vld [vmem:[#allocation7 + $0xd0] sm:$0xff] }
  0x2b   :  { %147 = vmatpush.msra.mxu0 %v128_v11  ;;  %294 = vmatpush.msra.mxu1 %v260_v42  ;;  %v251_v57 = vld [vmem:[#allocation7 + $0xd8] sm:$0xff]  ;;  %v244_v58 = vld [vmem:[#allocation7 + $0xa0] sm:$0xff]  ;;  %v245_v59 = vld [vmem:[#allocation7 + $0xa8] sm:$0xff] }
  0x2c   :  { %314 = vmatpush.msra.mxu2 %v261_v43  ;;  %334 = vmatpush.msra.mxu3 %v262_v44  ;;  %v246_v60 = vld [vmem:[#allocation7 + $0xb0] sm:$0xff]  ;;  %v247_v61 = vld [vmem:[#allocation7 + $0xb8] sm:$0xff]  ;;  %v240_v62 = vld [vmem:[#allocation7 + $0x80] sm:$0xff] }
  0x2d   :  { %148 = vmatpush.msra.mxu0 %v127_v12  ;;  %295 = vmatpush.msra.mxu1 %v256_v46  ;;  %v241_v63 = vld [vmem:[#allocation7 + $0x88] sm:$0xff]  ;;  %v242_v0 = vld [vmem:[#allocation7 + $0x90] sm:$0xff]  ;;  %v243_v1 = vld [vmem:[#allocation7 + $0x98] sm:$0xff] }
  0x2e   :  { %315 = vmatpush.msra.mxu2 %v257_v47  ;;  %335 = vmatpush.msra.mxu3 %v258_v48  ;;  %v236_v2 = vld [vmem:[#allocation7 + $0x60] sm:$0xff]  ;;  %v237_v3 = vld [vmem:[#allocation7 + $0x68] sm:$0xff]  ;;  %v238_v5 = vld [vmem:[#allocation7 + $0x70] sm:$0xff] }
  0x2f   :  { %149 = vmatpush.msra.mxu0 %v126_v13  ;;  %296 = vmatpush.msra.mxu1 %v252_v50  ;;  %v239_v6 = vld [vmem:[#allocation7 + $0x78] sm:$0xff]  ;;  %v232_v7 = vld [vmem:[#allocation7 + $0x40] sm:$0xff]  ;;  %v233_v8 = vld [vmem:[#allocation7 + $0x48] sm:$0xff]  ;;  %v115_v13 = vand.u32 127, %v114_v4 }
  0x30   :  { %316 = vmatpush.msra.mxu2 %v253_v51  ;;  %336 = vmatpush.msra.mxu3 %v254_v52  ;;  %v234_v9 = vld [vmem:[#allocation7 + $0x50] sm:$0xff]  ;;  %v235_v10 = vld [vmem:[#allocation7 + $0x58] sm:$0xff]  ;;  %v228_v11 = vld [vmem:[#allocation7 + $0x20] sm:$0xff] }
  0x31   :  { %150 = vmatpush.msra.mxu0 %v125_v14  ;;  %297 = vmatpush.msra.mxu1 %v248_v54  ;;  %v229_v12 = vld [vmem:[#allocation7 + $0x28] sm:$0xff]  ;;  %v230_v14 = vld [vmem:[#allocation7 + $0x30] sm:$0xff]  ;;  %v227_v20 = vld [vmem:[#allocation7 + $0x18] sm:$0xff] }
  0x32   :  { %317 = vmatpush.msra.mxu2 %v249_v55  ;;  %337 = vmatpush.msra.mxu3 %v250_v56  ;;  %v226_v18 = vld [vmem:[#allocation7 + $0x10] sm:$0xff]  ;;  %v221_v22 = vld [vmem:[#allocation5 + $0x1e8] sm:$0xff]  ;;  %v216_v26 = vld [vmem:[#allocation5 + $0x1c0] sm:$0xff] }
  0x33   :  { %151 = vmatpush.msra.mxu0 %v124_v15  ;;  %298 = vmatpush.msra.mxu1 %v244_v58  ;;  %v231_v15 = vld [vmem:[#allocation7 + $0x38] sm:$0xff]  ;;  %v222_v23 = vld [vmem:[#allocation5 + $0x1f0] sm:$0xff]  ;;  %v217_v27 = vld [vmem:[#allocation5 + $0x1c8] sm:$0xff] }
  0x34   :  { %318 = vmatpush.msra.mxu2 %v245_v59  ;;  %338 = vmatpush.msra.mxu3 %v246_v60  ;;  %v218_v28 = vld [vmem:[#allocation5 + $0x1d0] sm:$0xff]  ;;  %v212_v30 = vld [vmem:[#allocation5 + $0x1a0] sm:$0xff]  ;;  %v213_v31 = vld [vmem:[#allocation5 + $0x1a8] sm:$0xff] }
  0x35   :  { %152 = vmatpush.msra.mxu0 %v123_v16  ;;  %299 = vmatpush.msra.mxu1 %v240_v62  ;;  %v224_v16 = vld [vmem:[#allocation7] sm:$0xff]  ;;  %v214_v32 = vld [vmem:[#allocation5 + $0x1b0] sm:$0xff]  ;;  %v209_v35 = vld [vmem:[#allocation5 + $0x188] sm:$0xff] }
  0x36   :  { %319 = vmatpush.msra.mxu2 %v241_v63  ;;  %339 = vmatpush.msra.mxu3 %v242_v0  ;;  %v208_v34 = vld [vmem:[#allocation5 + $0x180] sm:$0xff]  ;;  %v210_v36 = vld [vmem:[#allocation5 + $0x190] sm:$0xff]  ;;  %v205_v39 = vld [vmem:[#allocation5 + $0x168] sm:$0xff] }
  0x37   :  { %153 = vmatpush.msra.mxu0 %v122_v17  ;;  %300 = vmatpush.msra.mxu1 %v236_v2  ;;  %v225_v17 = vld [vmem:[#allocation7 + $0x8] sm:$0xff]  ;;  %v204_v38 = vld [vmem:[#allocation5 + $0x160] sm:$0xff]  ;;  %v206_v40 = vld [vmem:[#allocation5 + $0x170] sm:$0xff] }
  0x38   :  { %320 = vmatpush.msra.mxu2 %v237_v3  ;;  %340 = vmatpush.msra.mxu3 %v238_v5  ;;  %v200_v42 = vld [vmem:[#allocation5 + $0x140] sm:$0xff]  ;;  %v201_v43 = vld [vmem:[#allocation5 + $0x148] sm:$0xff]  ;;  %v202_v44 = vld [vmem:[#allocation5 + $0x150] sm:$0xff] }
  0x39   :  { %348 = vmatpush.msrb.mxu0 %v287_v21  ;;  %301 = vmatpush.msra.mxu1 %v232_v7  ;;  %v220_v21 = vld [vmem:[#allocation5 + $0x1e0] sm:$0xff]  ;;  %v197_v47 = vld [vmem:[#allocation5 + $0x128] sm:$0xff]  ;;  %v198_v48 = vld [vmem:[#allocation5 + $0x130] sm:$0xff] }
  0x3a   :  { %321 = vmatpush.msra.mxu2 %v233_v8  ;;  %341 = vmatpush.msra.mxu3 %v234_v9  ;;  %v196_v46 = vld [vmem:[#allocation5 + $0x120] sm:$0xff]  ;;  %v193_v51 = vld [vmem:[#allocation5 + $0x108] sm:$0xff]  ;;  %v194_v52 = vld [vmem:[#allocation5 + $0x110] sm:$0xff] }
  0x3b   :  { %349 = vmatpush.msrb.mxu0 %v283_v25  ;;  %302 = vmatpush.msra.mxu1 %v228_v11  ;;  %v223_v25 = vld [vmem:[#allocation5 + $0x1f8] sm:$0xff]  ;;  %v192_v50 = vld [vmem:[#allocation5 + $0x100] sm:$0xff]  ;;  %v189_v55 = vld [vmem:[#allocation5 + $0xe8] sm:$0xff] }
  0x3c   :  { %322 = vmatpush.msra.mxu2 %v229_v12  ;;  %342 = vmatpush.msra.mxu3 %v230_v14  ;;  %v188_v54 = vld [vmem:[#allocation5 + $0xe0] sm:$0xff]  ;;  %v190_v56 = vld [vmem:[#allocation5 + $0xf0] sm:$0xff]  ;;  %v185_v59 = vld [vmem:[#allocation5 + $0xc8] sm:$0xff] }
  0x3d   :  { %350 = vmatpush.msrb.mxu0 %v279_v29  ;;  %303 = vmatpush.msra.mxu1 %v224_v16  ;;  %v219_v29 = vld [vmem:[#allocation5 + $0x1d8] sm:$0xff]  ;;  %v184_v58 = vld [vmem:[#allocation5 + $0xc0] sm:$0xff]  ;;  %v186_v60 = vld [vmem:[#allocation5 + $0xd0] sm:$0xff] }
  0x3e   :  { %323 = vmatpush.msra.mxu2 %v225_v17  ;;  %343 = vmatpush.msra.mxu3 %v226_v18  ;;  %v180_v62 = vld [vmem:[#allocation5 + $0xa0] sm:$0xff]  ;;  %v181_v63 = vld [vmem:[#allocation5 + $0xa8] sm:$0xff]  ;;  %v182_v0 = vld [vmem:[#allocation5 + $0xb0] sm:$0xff] }
  0x3f   :  { %351 = vmatpush.msrb.mxu0 %v275_v33  ;;  %368 = vmatpush.msrb.mxu1 %v220_v21  ;;  %v215_v33 = vld [vmem:[#allocation5 + $0x1b8] sm:$0xff]  ;;  %v176_v2 = vld [vmem:[#allocation5 + $0x80] sm:$0xff]  ;;  %v177_v3 = vld [vmem:[#allocation5 + $0x88] sm:$0xff] }
  0x40   :  { %388 = vmatpush.msrb.mxu2 %v221_v22  ;;  %408 = vmatpush.msrb.mxu3 %v222_v23  ;;  %v178_v4 = vld [vmem:[#allocation5 + $0x90] sm:$0xff]  ;;  %v179_v5 = vld [vmem:[#allocation5 + $0x98] sm:$0xff]  ;;  %v172_v7 = vld [vmem:[#allocation5 + $0x60] sm:$0xff] }
  0x41   :  { %352 = vmatpush.msrb.mxu0 %v271_v37  ;;  %369 = vmatpush.msrb.mxu1 %v216_v26  ;;  %v211_v37 = vld [vmem:[#allocation5 + $0x198] sm:$0xff]  ;;  %v173_v8 = vld [vmem:[#allocation5 + $0x68] sm:$0xff]  ;;  %v174_v9 = vld [vmem:[#allocation5 + $0x70] sm:$0xff] }
  0x42   :  { %389 = vmatpush.msrb.mxu2 %v217_v27  ;;  %409 = vmatpush.msrb.mxu3 %v218_v28  ;;  %v168_v11 = vld [vmem:[#allocation5 + $0x40] sm:$0xff]  ;;  %v169_v12 = vld [vmem:[#allocation5 + $0x48] sm:$0xff]  ;;  %v171_v14 = vld [vmem:[#allocation5 + $0x58] sm:$0xff] }
  0x43   :  { %353 = vmatpush.msrb.mxu0 %v267_v41  ;;  %370 = vmatpush.msrb.mxu1 %v212_v30  ;;  %v207_v41 = vld [vmem:[#allocation5 + $0x178] sm:$0xff]  ;;  %v165_v16 = vld [vmem:[#allocation5 + $0x28] sm:$0xff]  ;;  %v166_v17 = vld [vmem:[#allocation5 + $0x30] sm:$0xff] }
  0x44   :  { %390 = vmatpush.msrb.mxu2 %v213_v31  ;;  %410 = vmatpush.msrb.mxu3 %v214_v32  ;;  %v167_v18 = vld [vmem:[#allocation5 + $0x38] sm:$0xff]  ;;  %v162_v21 = vld [vmem:[#allocation5 + $0x10] sm:$0xff]  ;;  %v952_v31 = vld [vmem:[#allocation8] sm:$0xf] }
  0x45   :  { %354 = vmatpush.msrb.mxu0 %v263_v45  ;;  %371 = vmatpush.msrb.mxu1 %v208_v34  ;;  %v203_v45 = vld [vmem:[#allocation5 + $0x158] sm:$0xff]  ;;  %v538_v28 = vld [vmem:[#allocation10 + $0x68] sm:$0xff] }
  0x46   :  { %391 = vmatpush.msrb.mxu2 %v209_v35  ;;  %411 = vmatpush.msrb.mxu3 %v210_v36  ;;  %v163_v22 = vld [vmem:[#allocation5 + $0x18] sm:$0xff]  ;;  %v453_v36 = vperm.slane %v952_v31, 3 }
  0x47   :  { %355 = vmatpush.msrb.mxu0 %v259_v49  ;;  %372 = vmatpush.msrb.mxu1 %v204_v38  ;;  %v199_v49 = vld [vmem:[#allocation5 + $0x138] sm:$0xff] }
  0x48   :  { %392 = vmatpush.msrb.mxu2 %v205_v39  ;;  %412 = vmatpush.msrb.mxu3 %v206_v40  ;;  %v539_v27 = vld [vmem:[#allocation10 + $0x70] sm:$0xff]  ;;  %v536_v32 = vld [vmem:[#allocation10 + $0x58] sm:$0xff]  ;;  %v534_v39 = vld [vmem:[#allocation10 + $0x48] sm:$0xff] }
  0x49   :  { %356 = vmatpush.msrb.mxu0 %v255_v53  ;;  %373 = vmatpush.msrb.mxu1 %v200_v42  ;;  %v195_v53 = vld [vmem:[#allocation5 + $0x118] sm:$0xff]  ;;  %v533_v42 = vld [vmem:[#allocation10 + $0x40] sm:$0xff] }
  0x4a   :  { %393 = vmatpush.msrb.mxu2 %v201_v43  ;;  %413 = vmatpush.msrb.mxu3 %v202_v44  ;;  %v535_v34 = vld [vmem:[#allocation10 + $0x50] sm:$0xff] }
  0x4b   :  { %357 = vmatpush.msrb.mxu0 %v251_v57  ;;  %374 = vmatpush.msrb.mxu1 %v196_v46  ;;  %v191_v57 = vld [vmem:[#allocation5 + $0xf8] sm:$0xff] }
  0x4c   :  { %394 = vmatpush.msrb.mxu2 %v197_v47  ;;  %414 = vmatpush.msrb.mxu3 %v198_v48  ;;  %v532_v46 = vld [vmem:[#allocation10 + $0x38] sm:$0xff] }
  0x4d   :  { %358 = vmatpush.msrb.mxu0 %v247_v61  ;;  %375 = vmatpush.msrb.mxu1 %v192_v50  ;;  %v187_v61 = vld [vmem:[#allocation5 + $0xd8] sm:$0xff] }
  0x4e   :  { %395 = vmatpush.msrb.mxu2 %v193_v51  ;;  %415 = vmatpush.msrb.mxu3 %v194_v52  ;;  %v531_v50 = vld [vmem:[#allocation10 + $0x30] sm:$0xff]  ;;  %v530_v52 = vld [vmem:[#allocation10 + $0x28] sm:$0xff] }
  0x4f   :  { %359 = vmatpush.msrb.mxu0 %v243_v1  ;;  %376 = vmatpush.msrb.mxu1 %v188_v54  ;;  %v183_v1 = vld [vmem:[#allocation5 + $0xb8] sm:$0xff] }
  0x50   :  { %396 = vmatpush.msrb.mxu2 %v189_v55  ;;  %416 = vmatpush.msrb.mxu3 %v190_v56  ;;  %v529_v55 = vld [vmem:[#allocation10 + $0x20] sm:$0xff]  ;;  %v528_v56 = vld [vmem:[#allocation10 + $0x18] sm:$0xff] }
  0x51   :  { %360 = vmatpush.msrb.mxu0 %v239_v6  ;;  %377 = vmatpush.msrb.mxu1 %v184_v58  ;;  %v158_v6 = vld [vmem:[%s974_s1] sm:$0xff]  ;;  %v527_v58 = vld [vmem:[#allocation10 + $0x10] sm:$0xff] }
  0x52   :  { %397 = vmatpush.msrb.mxu2 %v185_v59  ;;  %417 = vmatpush.msrb.mxu3 %v186_v60 }
  0x53   :  { %361 = vmatpush.msrb.mxu0 %v235_v10  ;;  %378 = vmatpush.msrb.mxu1 %v180_v62  ;;  %v175_v10 = vld [vmem:[#allocation5 + $0x78] sm:$0xff] }
  0x54   :  { %398 = vmatpush.msrb.mxu2 %v181_v63  ;;  %418 = vmatpush.msrb.mxu3 %v182_v0  ;;  %v525_v63 = vld [vmem:[#allocation10] sm:$0xff] }
  0x55   :  { %362 = vmatpush.msrb.mxu0 %v231_v15  ;;  %379 = vmatpush.msrb.mxu1 %v176_v2  ;;  %v164_v15 = vld [vmem:[#allocation5 + $0x20] sm:$0xff] }
  0x56   :  { %399 = vmatpush.msrb.mxu2 %v177_v3  ;;  %419 = vmatpush.msrb.mxu3 %v178_v4 }
  0x57   :  { %363 = vmatpush.msrb.mxu0 %v227_v20  ;;  %304 = vmatmul.f32.vlgmr.msra.gmra.mxu1 %v158_v6  ;;  %v161_v20 = vld [vmem:[#allocation5 + $0x8] sm:$0xff] }
  0x58   :  { %324 = vmatmul.f32.vlgmr.msra.gmra.mxu2 %v158_v6  ;;  %344 = vmatmul.f32.vlgmr.msra.gmra.mxu3 %v158_v6 }
  0x59   :  { %380 = vmatpush.msrb.mxu1 %v172_v7  ;;  %400 = vmatpush.msrb.mxu2 %v173_v8 }
  0x5a   :  { %420 = vmatpush.msrb.mxu3 %v174_v9 }
  0x5b   :  { %381 = vmatpush.msrb.mxu1 %v168_v11  ;;  %401 = vmatpush.msrb.mxu2 %v169_v12 }
  0x5d   :  { %382 = vmatpush.msrb.mxu1 %v164_v15  ;;  %402 = vmatpush.msrb.mxu2 %v165_v16 }
  0x5f   :  { %403 = vmatpush.msrb.mxu2 %v161_v20 }
  0x8c   :  { %v118_v19 = vpop.permute.xlu0 %117 }
  0x8d   :  { %vm119_vm0 = vcmp.eq.s32.totalorder %v118_v19, %v115_v13  ;;  %v170_v13 = vld [vmem:[#allocation5 + $0x50] sm:$0xff]  ;;  %v160_v19 = vld [vmem:[#allocation5] sm:$0xff] }
  0x8e   :  { %619 = vmatmul.msk.f32.vlgmr.msra.gmra.mxu0 %vm119_vm0, %v867_v24  ;;  %421 = vmatpush.msrb.mxu3 %v170_v13  ;;  %v540_v24 = vld [vmem:[#allocation10 + $0x78] sm:$0xff] }
  0x8f   :  { %428 = vmatpush.msra.mxu0 %v223_v25  ;;  %383 = vmatpush.msrb.mxu1 %v160_v19 }
  0x90   :  { %422 = vmatpush.msrb.mxu3 %v166_v17 }
  0x91   :  { %429 = vmatpush.msra.mxu0 %v219_v29  ;;  %545 = vmatpush.msra.mxu1 %v540_v24  ;;  %v537_v29 = vld [vmem:[#allocation10 + $0x60] sm:$0xff] }
  0x92   :  { %423 = vmatpush.msrb.mxu3 %v162_v21 }
  0x93   :  { %430 = vmatpush.msra.mxu0 %v215_v33  ;;  %546 = vmatpush.msra.mxu1 %v539_v27  ;;  %v450_v33 = vperm.slane %v952_v31, 0 }
  0x95   :  { %431 = vmatpush.msra.mxu0 %v211_v37  ;;  %547 = vmatpush.msra.mxu1 %v538_v28 }
  0x96   :  { %364 = vmatmul.f32.vlgmr.msrb.gmra.mxu0 %v158_v6  ;;  %v452_v6 = vperm.slane %v952_v31, 2 }
  0x97   :  { %432 = vmatpush.msra.mxu0 %v207_v41  ;;  %548 = vmatpush.msra.mxu1 %v537_v29 }
  0x99   :  { %433 = vmatpush.msra.mxu0 %v203_v45  ;;  %549 = vmatpush.msra.mxu1 %v536_v32  ;;  %v451_v45 = vperm.slane %v952_v31, 1 }
  0x9b   :  { %434 = vmatpush.msra.mxu0 %v199_v49  ;;  %550 = vmatpush.msra.mxu1 %v535_v34 }
  0x9d   :  { %435 = vmatpush.msra.mxu0 %v195_v53  ;;  %551 = vmatpush.msra.mxu1 %v534_v39 }
  0x9f   :  { %436 = vmatpush.msra.mxu0 %v191_v57  ;;  %552 = vmatpush.msra.mxu1 %v533_v42 }
  0xa1   :  { %437 = vmatpush.msra.mxu0 %v187_v61  ;;  %553 = vmatpush.msra.mxu1 %v532_v46  ;;  %v526_v61 = vld [vmem:[#allocation10 + $0x8] sm:$0xff] }
  0xa3   :  { %438 = vmatpush.msra.mxu0 %v183_v1  ;;  %554 = vmatpush.msra.mxu1 %v531_v50 }
  0xa5   :  { %439 = vmatpush.msra.mxu0 %v179_v5  ;;  %555 = vmatpush.msra.mxu1 %v530_v52 }
  0xa7   :  { %440 = vmatpush.msra.mxu0 %v175_v10  ;;  %556 = vmatpush.msra.mxu1 %v529_v55 }
  0xa9   :  { %441 = vmatpush.msra.mxu0 %v171_v14  ;;  %557 = vmatpush.msra.mxu1 %v528_v56 }
  0xab   :  { %442 = vmatpush.msra.mxu0 %v167_v18  ;;  %558 = vmatpush.msra.mxu1 %v527_v58 }
  0xad   :  { %443 = vmatpush.msra.mxu0 %v163_v22  ;;  %559 = vmatpush.msra.mxu1 %v526_v61 }
  0xaf   :  { %560 = vmatpush.msra.mxu1 %v525_v63 }
  0xd4   :  { %v305_v25 = vpop.f32.mrf.mxu1 }
  0xdb   :  { %v325_v30 = vpop.f32.mrf.mxu2  ;;  %v345_v53 = vpop.f32.mrf.mxu3 }
 0x10b   :  { %v155_v23 = vpop.f32.mrf.mxu0 }
 0x10c   :  { %384 = vmatmul.f32.vlgmr.msrb.gmra.mxu1 %v155_v23  ;;  %404 = vmatmul.f32.vlgmr.msrb.gmra.mxu2 %v155_v23 }
 0x10d   :  { %424 = vmatmul.f32.vlgmr.msrb.gmra.mxu3 %v155_v23  ;;  %444 = vmatmul.f32.vlgmr.msra.gmra.mxu0 %v155_v23 }
 0x113   :  { %v365_v26 = vpop.f32.mrf.mxu0 }
 0x189   :  { %v385_v35 = vpop.f32.mrf.mxu1 }
 0x18a   :  { %v386_v37 = vadd.f32 %v385_v35, %v305_v25  ;;  %v445_v38 = vpop.f32.mrf.mxu0 }
 0x18b   :  { %v446_v40 = vadd.f32 %v445_v38, %v365_v26  ;;  %v159_v26 = vld [vmem:[%s975_s2] sm:$0xff]  ;;  %s868_s2 = smov [#allocation12]  }
 0x18c   :  { %v458_v41 = vadd.f32 %v450_v33, %v386_v37  ;;  %s584_s26 = sshll.u32 %s868_s2, 4  ;;  %s585_s26 = int_to_ptr.vmem [resolvable:$true] %s584_s26 }
 0x18d   :  { %v461_v43 = vadd.f32 %v453_v36, %v446_v40 }
 0x18e   :  { %v620_v44 = vmul.f32 -1.442695, %v458_v41 }
 0x18f   :  { %v622_v47 = vmul.f32 -1.442695, %v461_v43  ;;  %v405_v48 = vpop.f32.mrf.mxu2  ;;  %v638_v43 = vld [vmem:[%s981_s8] ss:$0 sm:$0xff] }
 0x190   :  { %639 = vpow2.f32 %v620_v44  ;;  %v406_v49 = vadd.f32 %v405_v48, %v325_v30  ;;  %v425_v2 = vpop.f32.mrf.mxu3 }
 0x191   :  { %641 = vpow2.f32 %v622_v47  ;;  %v426_v5 = vadd.f32 %v425_v2, %v345_v53 }
 0x192   :  { %v459_v51 = vadd.f32 %v451_v45, %v406_v49 }
 0x193   :  { %v460_v11 = vadd.f32 %v452_v6, %v426_v5 }
 0x194   :  { %v621_v54 = vmul.f32 -1.442695, %v459_v51 }
 0x196   :  { %v640_v57 = vpop.eup %639  ;;  %643 = vpow2.f32 %v621_v54 }
 0x197   :  { %v642_v59 = vpop.eup %641  ;;  %v465_v60 = vadd.f32 1.0, %v640_v57 }
 0x198   :  { %v504_v62 = vadd.f32 1.0, %v642_v59 }
 0x199   :  { %645 = vrcp.f32 %v465_v60  ;;  %v477_v15 = vand.u32 2147483648, %v465_v60  ;;  %vm471_vm2 = vweird.f32 %v465_v60  ;;  %v475_v17 = vand.u32 2147483647, %v465_v60 }
 0x19a   :  { %647 = vrcp.f32 %v504_v62  ;;  %v516_v36 = vand.u32 2147483648, %v504_v62  ;;  %vm510_vm10 = vweird.f32 %v504_v62  ;;  %v514_v37 = vand.u32 2147483647, %v504_v62 }
 0x19b   :  { %v478_v23 = vor.u32 1.1754944e-38, %v477_v15  ;;  %vm476_vm6 = vcmp.eq.f32.partialorder %v475_v17, 8.507059e+37 }
 0x19c   :  { %v644_v0 = vpop.eup %643  ;;  %v517_v39 = vor.u32 1.1754944e-38, %v516_v36  ;;  %vm515_vm12 = vcmp.eq.f32.partialorder %v514_v37, 8.507059e+37 }
 0x19d   :  { %v484_v1 = vadd.f32 1.0, %v644_v0 }
 0x19f   :  { %v646_v3 = vpop.eup %645  ;;  %649 = vrcp.f32 %v484_v1  ;;  %v496_v18 = vand.u32 2147483648, %v484_v1  ;;  %v494_v21 = vand.u32 2147483647, %v484_v1  ;;  %vm490_vm5 = vweird.f32 %v484_v1 }
 0x1a0   :  { %v467_v4 = vmul.f32 %v646_v3, %v465_v60  ;;  %v648_v8 = vpop.eup %647  ;;  %vm472_vm1 = vweird.f32 %v646_v3  ;;  %651 = vtanh.f32 %v460_v11 }
 0x1a1   :  { %v506_v14 = vmul.f32 %v648_v8, %v504_v62  ;;  %vm473_vm3 = vmor %vm471_vm2, %vm472_vm1  ;;  %v497_v25 = vor.u32 1.1754944e-38, %v496_v18  ;;  %vm495_vm8 = vcmp.eq.f32.partialorder %v494_v21, 8.507059e+37  ;;  %vm511_vm9 = vweird.f32 %v648_v8 }
 0x1a2   :  { %v468_v7 = vsub.f32 1.0, %v467_v4  ;;  %vm512_vm11 = vmor %vm510_vm10, %vm511_vm9 }
 0x1a3   :  { %v507_v22 = vsub.f32 1.0, %v506_v14 }
 0x1a4   :  { %v469_v9 = vmul.f32 %v646_v3, %v468_v7 }
 0x1a5   :  { %v650_v10 = vpop.eup %649  ;;  %v508_v31 = vmul.f32 %v648_v8, %v507_v22 }
 0x1a6   :  { %v486_v12 = vmul.f32 %v650_v10, %v484_v1  ;;  %v470_v13 = vadd.f32 %v646_v3, %v469_v9  ;;  %vm491_vm4 = vweird.f32 %v650_v10  ;;  %v652_v29 = vpop.eup %651 }
 0x1a7   :  { %vm492_vm7 = vmor %vm490_vm5, %vm491_vm4  ;;  %v509_v35 = vadd.f32 %v648_v8, %v508_v31 }
 0x1a8   :  { %v487_v16 = vsub.f32 1.0, %v486_v12  ;;  %v474_v20 = vsel %vm473_vm3, %v646_v3, %v470_v13 }
 0x1a9   :  { %v479_v27 = vsel %vm476_vm6, %v478_v23, %v474_v20  ;;  %v513_v38 = vsel %vm512_vm11, %v648_v8, %v509_v35 }
 0x1aa   :  { %v488_v19 = vmul.f32 %v650_v10, %v487_v16  ;;  %v521_v33 = vmul.f32 %v652_v29, %v479_v27  ;;  %v518_v41 = vsel %vm515_vm12, %v517_v39, %v513_v38 }
 0x1ac   :  { %v489_v24 = vadd.f32 %v650_v10, %v488_v19 }
 0x1ae   :  { %v493_v28 = vsel %vm492_vm7, %v650_v10, %v489_v24 }
 0x1af   :  { %v498_v30 = vsel %vm495_vm8, %v497_v25, %v493_v28 }
 0x1b0   :  { %v520_v32 = vmul.f32 %v498_v30, %v159_v26 }
 0x1b2   :  { %v522_v34 = vadd.f32 %v521_v33, %v520_v32 }
 0x1b4   :  { %653 = vtanh.f32 %v522_v34  ;;  %567 = vst [vmem:[#allocation14] sm:$0xff] %v522_v34 }
 0x1ba   :  { %v654_v40 = vpop.eup %653 }
 0x1bb   :  { %v524_v42 = vmul.f32 %v654_v40, %v518_v41 }
 0x1bd   :  { %561 = vmatmul.f32.vlgmr.msra.gmra.mxu1 %v524_v42  ;;  %566 = vst [vmem:[#allocation12] sm:$0xff] %v524_v42 }
 0x1be   :  { %589 = dma.vmem_to_hbm [thread:$0]  %s585_s26, 128, %s587_s29, [#allocation13]  }
 0x1bf   :  { %600 = dma.vmem_to_hbm [thread:$0]  %s596_s12, 128, %s598_s14, [#allocation13]  }
 0x23a   :  { %v562_v44 = vpop.f32.mrf.mxu1 }
 0x23b   :  { %v563_v45 = vadd.f32 %v638_v43, %v562_v44 }
 0x23d   :  { %565 = vst [vmem:[#allocation11] sm:$0xff] %v563_v45 }
 0x23e   :  { %578 = dma.vmem_to_hbm [thread:$0]  %s574_s10, 128, %s576_s19, [#allocation4]  }
 0x23f   :  { %853 = dma.done.wait [#allocation4], 128  }
 0x240   :  { %854 = vsyncadd [#allocation4], 4294967168 }
 0x241   :  { %855 = dma.done.wait [#allocation13], 256  }
 0x242   :  { %856 = vsyncadd [#allocation13], 4294967040 }
 0x243   :  { %613 = vsyncpa [#allocation3], 1 }
 0x244   :  { %614 = vsyncpa [#allocation6], 1 }
 0x245   :  { %615 = vsyncpa [#allocation9], 1 }
 0x246   :  { %616 = vsyncpa [#allocation4], 1 }
 0x247   :  { %617 = vsyncpa [#allocation13], 1 }

</bundles_post_ra>
